<compile_context>
chip_gen: v6e
topology: v6e:2x2x1
jax: 0.10.0
libtpu: 0.0.40
codegen_flags: <defaults>
</compile_context>

<pallas_src>
import functools

import jax
import jax.numpy as jnp
from jax.experimental import pallas as pl
from jax.experimental.pallas import tpu as pltpu


def _encoder_kernel(x_ref, w1_ref, w2_ref, sel_ref, o_ref, *,
                    L, K, C, TB, CH, use_mxu_conv1):
    # x_ref:   (TB, C, L)   one batch tile (input dtype, cast to f32 on load)
    # w1_ref:  (C, C*K)     conv1 weights  [o, c*K+k]      (VPU path), or
    #          (K*C, C)     conv1 weights, taps stacked    (MXU path)
    # w2_ref:  (C, K)       conv2 weights with the avg-pool 0.5 folded in
    # sel_ref: (CH, CH//2)  0/1 even-lane selection matrix (block diagonal)
    # o_ref:   (TB, L//2)   pooled-resolution tanh output
    pad = K // 2
    CHh = CH // 2

    # Small constant operands: load once per grid step (hoisted out of loops).
    w1 = w1_ref[...].astype(jnp.float32)
    w2 = w2_ref[...].astype(jnp.float32)
    sel = sel_ref[...]
    zcol = jnp.zeros((C, 1), jnp.float32)
    if pad > 0:
        zp1 = jnp.zeros((C, pad), jnp.float32)
        zp2 = jnp.zeros((C, 2 * pad), jnp.float32)

    # Per-batch-element loop: bounds the live vreg working set to one (C, L)
    # slab while the DMA block covers the whole TB-sized batch tile.
    for b in range(TB):
        x2d = x_ref[b].astype(jnp.float32)            # (C, L)

        # --- conv1 (C -> C, "same"): zero-extend once, taps are static slices.
        xp = jnp.concatenate([zp1, x2d, zp1], axis=1) if pad > 0 else x2d
        y = jnp.zeros((C, L), jnp.float32)
        for k in range(K):
            xk = xp[:, k:k + L]                       # == x[:, l + k - pad], 0 outside
            if use_mxu_conv1:
                # large-C path: per-tap (C, C) x (C, L) MXU matmul
                y = y + jnp.dot(w1[k * C:(k + 1) * C, :], xk,
                                preferred_element_type=jnp.float32)
            else:
                # small-C path: VPU broadcast-MAC (outer product of a (C,1)
                # weight column and a (1,L) input row) -- no MXU needed.
                for c in range(C):
                    y = y + w1[:, c * K + k:c * K + k + 1] * xk[c:c + 1, :]

        # --- relu ---
        y = jnp.maximum(y, 0.0)

        # --- avg_pool1d(kernel=2) at full resolution: s[l] = y[l] + y[l+1]
        #     (the 0.5 is folded into w2); only even l is consumed below. ---
        s = y + jnp.concatenate([y[:, 1:], zcol], axis=1)

        # --- conv2 (C -> 1) on the pooled sequence, evaluated at full
        #     resolution with doubled tap shifts: z_row[2j] == z_pooled[j]. ---
        sp = jnp.concatenate([zp2, s, zp2], axis=1) if pad > 0 else s
        acc = jnp.zeros((C, L), jnp.float32)
        for k in range(K):
            acc = acc + w2[:, k:k + 1] * sp[:, 2 * k:2 * k + L]
        z_row = jnp.sum(acc, axis=0, keepdims=True)   # (1, L) sublane reduce

        # --- pooled-resolution output: compact the even lanes with a 0/1
        #     selection matmul per lane chunk (idle MXU), then tanh, then a
        #     contiguous store.  No post-kernel stride-2 gather needed. ---
        for j in range(L // CH):
            zc = z_row[:, j * CH:(j + 1) * CH]                    # (1, CH)
            pooled = jnp.dot(zc, sel, preferred_element_type=jnp.float32)
            o_ref[b:b + 1, j * CHh:(j + 1) * CHh] = jnp.tanh(pooled)


def _pick_batch_tile(B, C, L, itemsize, *, target_block_bytes=2 << 20,
                     max_unroll=16):
    """Largest batch tile within the per-step byte budget; keep >=2 grid steps
    when B allows so v7x's two TensorCores both get work."""
    per_batch = max(C * L * itemsize, 1)
    best = 1
    for tb in range(1, min(B, max_unroll) + 1):
        if B % tb == 0 and tb * per_batch <= target_block_bytes:
            best = tb
    if B > 1 and B // best < 2:
        for tb in range(best - 1, 0, -1):
            if B % tb == 0 and B // tb >= 2:
                best = tb
                break
    return best


def _pick_pool_chunk(L, *, max_chunk=1024, max_chunks=64):
    """Even chunk width (divides L) for the even-lane selection matmul."""
    if L <= max_chunk:
        return L
    best = None
    for ch in range(max_chunk, 1, -1):
        if L % ch == 0 and ch % 2 == 0:
            best = ch
            break
    if best is None or L // best > max_chunks:
        # TODO(synk): for pathological L (huge with no mid-size even divisor)
        # the selection matrix gets large; a strided-store epilogue would be
        # the better tool there.
        best = L
    return best


def encoder_forward(x, w1, w2):
    """x: (B, C, L) f32 or bf16; w1: (C, C, K); w2: (1, C, K). Returns (B, L//2) f32."""
    B, C, L = x.shape
    C_out, C_in, K = w1.shape
    assert C_out == C and C_in == C
    assert w2.shape == (1, C, K)
    assert L % 2 == 0, "sequence length must be even"
    assert K % 2 == 1, "kernel size must be odd"
    Lh = L // 2

    TB = _pick_batch_tile(B, C, L, jnp.dtype(x.dtype).itemsize)
    G = B // TB
    CH = _pick_pool_chunk(L)
    CHh = CH // 2

    # conv1 path: VPU broadcast-MAC for small C, fused MXU tap-matmuls for big C.
    use_mxu_conv1 = C >= 64
    if use_mxu_conv1:
        w1p = jnp.transpose(w1, (2, 0, 1)).reshape(K * C, C).astype(jnp.float32)
        w1_spec = pl.BlockSpec((K * C, C), lambda g: (0, 0))
    else:
        w1p = w1.reshape(C, C * K).astype(jnp.float32)
        w1_spec = pl.BlockSpec((C, C * K), lambda g: (0, 0))

    # conv2 weights with the avg-pool 1/2 folded in (saves a VPU mul per lane).
    w2p = (0.5 * w2[0]).astype(jnp.float32)                       # (C, K)

    # 0/1 even-lane selection matrix: sel[2j, j] = 1.
    sel = (jnp.arange(CH)[:, None] == 2 * jnp.arange(CHh)[None, :]
           ).astype(jnp.float32)

    # Free reshape only -- no repack / transpose / pad pass over x.
    x4 = x.reshape(G, TB, C, L)

    kernel = functools.partial(_encoder_kernel, L=L, K=K, C=C, TB=TB, CH=CH,
                               use_mxu_conv1=use_mxu_conv1)

    out = pl.pallas_call(
        kernel,
        out_shape=jax.ShapeDtypeStruct((G, TB, Lh), jnp.float32),
        grid_spec=pltpu.PrefetchScalarGridSpec(
            num_scalar_prefetch=0,
            grid=(G,),
            in_specs=[
                pl.BlockSpec((None, TB, C, L), lambda g: (g, 0, 0, 0)),   # x tile
                w1_spec,                                                  # conv1 w
                pl.BlockSpec((C, K), lambda g: (0, 0)),                   # conv2 w
                pl.BlockSpec((CH, CHh), lambda g: (0, 0)),                # selection
            ],
            out_specs=pl.BlockSpec((None, TB, Lh), lambda g: (g, 0, 0)),
        ),
        compiler_params=pltpu.CompilerParams(
            dimension_semantics=("parallel",)),
    )(x4, w1p, w2p, sel)

    # Pooled-resolution output came straight from the kernel; just un-tile.
    return out.reshape(B, Lh)


def _reference(x, w1, w2):
    """Pure-JAX reference with PyTorch-equivalent math (sanity check)."""
    B, C, L = x.shape
    K = w1.shape[2]
    pad = K // 2
    Lh = L // 2
    xf = x.astype(jnp.float32)
    xp = jnp.pad(xf, ((0, 0), (0, 0), (pad, pad)))
    y = jnp.zeros((B, C, L), jnp.float32)
    for k in range(K):
        y = y + jnp.einsum("oc,bcl->bol", w1[:, :, k], xp[:, :, k:k + L])
    y = jnp.maximum(y, 0.0)
    p = y.reshape(B, C, Lh, 2).mean(axis=-1)
    pp = jnp.pad(p, ((0, 0), (0, 0), (pad, pad)))
    z = jnp.zeros((B, 1, Lh), jnp.float32)
    for k in range(K):
        z = z + jnp.einsum("oc,bcl->bol", w2[:, :, k], pp[:, :, k:k + Lh])
    return jnp.tanh(z.reshape(B, Lh))


if __name__ == "__main__":
    # Small shapes consistent with the module's forward: (B, C, L), L even.
    B, C, L, K = 2, 4, 16, 3

    key = jax.random.PRNGKey(0)
    kx, k1, k2 = jax.random.split(key, 3)

    # Deterministic synthetic parameters (PyTorch-Conv1d-like uniform init).
    bound = (1.0 / (C * K)) ** 0.5
    w1 = jax.random.uniform(k1, (C, C, K), jnp.float32, -bound, bound)
    w2 = jax.random.uniform(k2, (1, C, K), jnp.float32, -bound, bound)
    x = jax.random.uniform(kx, (B, C, L), jnp.float32)

    # f32 path (exact check against the pure-JAX reference).
    out = jax.block_until_ready(encoder_forward(x, w1, w2))
    ref = _reference(x, w1, w2)
    assert out.shape == (B, L // 2)
    assert jnp.allclose(out, ref, atol=1e-5, rtol=1e-5)

    # bf16-input path: the caller hands over bf16 x, so the kernel's x DMA
    # bytes are halved on every TPU generation; all in-kernel math stays f32.
    out_bf16 = jax.block_until_ready(
        encoder_forward(x.astype(jnp.bfloat16), w1, w2))
    assert jnp.allclose(out_bf16, ref, atol=2e-2, rtol=2e-2)

    print("KERNEL_OK")
</pallas_src>

<mosaic_0001>
module attributes {stable_mosaic.version = 11 : i64} {
  func.func @_encoder_kernel(%arg0: i32, %arg1: memref<1x1x4x16xf32, #tpu.memory_space<vmem>>, %arg2: memref<4x12xf32, #tpu.memory_space<vmem>>, %arg3: memref<4x3xf32, #tpu.memory_space<vmem>>, %arg4: memref<16x8xf32, #tpu.memory_space<vmem>>, %arg5: memref<1x1x8xf32, #tpu.memory_space<vmem>>) attributes {dimension_semantics = [#tpu.dimension_semantics<parallel>], iteration_bounds = array<i64: 2>, scalar_prefetch = 0 : i64, scratch_operands = 0 : i64, tpu.core_type = #tpu.core_type<tc>, window_params = [{transform_indices = @transform_0, window_bounds = array<i64: 1, 1, 4, 16>}, {pipeline_mode = #tpu.pipeline_mode<synchronous>, transform_indices = @transform_1, window_bounds = array<i64: 4, 12>}, {pipeline_mode = #tpu.pipeline_mode<synchronous>, transform_indices = @transform_2, window_bounds = array<i64: 4, 3>}, {pipeline_mode = #tpu.pipeline_mode<synchronous>, transform_indices = @transform_3, window_bounds = array<i64: 16, 8>}, {transform_indices = @transform_4, window_bounds = array<i64: 1, 1, 8>}]} {
    %c0 = arith.constant 0 : index
    %c0_0 = arith.constant 0 : index
    %0 = vector.load %arg2[%c0, %c0_0] : memref<4x12xf32, #tpu.memory_space<vmem>>, vector<4x12xf32>
    %c0_1 = arith.constant 0 : index
    %c0_2 = arith.constant 0 : index
    %1 = vector.load %arg3[%c0_1, %c0_2] : memref<4x3xf32, #tpu.memory_space<vmem>>, vector<4x3xf32>
    %c0_3 = arith.constant 0 : index
    %c0_4 = arith.constant 0 : index
    %2 = vector.load %arg4[%c0_3, %c0_4] : memref<16x8xf32, #tpu.memory_space<vmem>>, vector<16x8xf32>
    %cst = arith.constant 0.000000e+00 : f32
    %3 = vector.broadcast %cst : f32 to vector<4x1xf32>
    %cst_5 = arith.constant 0.000000e+00 : f32
    %4 = vector.broadcast %cst_5 : f32 to vector<4x1xf32>
    %cst_6 = arith.constant 0.000000e+00 : f32
    %5 = vector.broadcast %cst_6 : f32 to vector<4x2xf32>
    %c0_7 = arith.constant 0 : index
    %c0_8 = arith.constant 0 : index
    %c0_9 = arith.constant 0 : index
    %c0_10 = arith.constant 0 : index
    %6 = vector.load %arg1[%c0_7, %c0_8, %c0_9, %c0_10] : memref<1x1x4x16xf32, #tpu.memory_space<vmem>>, vector<1x1x4x16xf32>
    %7 = vector.shape_cast %6 : vector<1x1x4x16xf32> to vector<4x16xf32>
    %8 = tpu.concatenate %4, %7, %4 in 1 : vector<4x1xf32>, vector<4x16xf32>, vector<4x1xf32> -> vector<4x18xf32>
    %cst_11 = arith.constant 0.000000e+00 : f32
    %9 = vector.broadcast %cst_11 : f32 to vector<4x16xf32>
    %10 = vector.extract_strided_slice %8 {offsets = [0, 0], sizes = [4, 16], strides = [1, 1]} : vector<4x18xf32> to vector<4x16xf32>
    %11 = vector.extract_strided_slice %0 {offsets = [0, 0], sizes = [4, 1], strides = [1, 1]} : vector<4x12xf32> to vector<4x1xf32>
    %12 = vector.extract_strided_slice %10 {offsets = [0, 0], sizes = [1, 16], strides = [1, 1]} : vector<4x16xf32> to vector<1x16xf32>
    %13 = vector.broadcast %11 : vector<4x1xf32> to vector<4x16xf32>
    %14 = vector.broadcast %12 : vector<1x16xf32> to vector<4x16xf32>
    %15 = arith.mulf %13, %14 : vector<4x16xf32>
    %16 = arith.addf %9, %15 : vector<4x16xf32>
    %17 = vector.extract_strided_slice %0 {offsets = [0, 3], sizes = [4, 1], strides = [1, 1]} : vector<4x12xf32> to vector<4x1xf32>
    %18 = vector.extract_strided_slice %10 {offsets = [1, 0], sizes = [1, 16], strides = [1, 1]} : vector<4x16xf32> to vector<1x16xf32>
    %19 = vector.broadcast %17 : vector<4x1xf32> to vector<4x16xf32>
    %20 = vector.broadcast %18 : vector<1x16xf32> to vector<4x16xf32>
    %21 = arith.mulf %19, %20 : vector<4x16xf32>
    %22 = arith.addf %16, %21 : vector<4x16xf32>
    %23 = vector.extract_strided_slice %0 {offsets = [0, 6], sizes = [4, 1], strides = [1, 1]} : vector<4x12xf32> to vector<4x1xf32>
    %24 = vector.extract_strided_slice %10 {offsets = [2, 0], sizes = [1, 16], strides = [1, 1]} : vector<4x16xf32> to vector<1x16xf32>
    %25 = vector.broadcast %23 : vector<4x1xf32> to vector<4x16xf32>
    %26 = vector.broadcast %24 : vector<1x16xf32> to vector<4x16xf32>
    %27 = arith.mulf %25, %26 : vector<4x16xf32>
    %28 = arith.addf %22, %27 : vector<4x16xf32>
    %29 = vector.extract_strided_slice %0 {offsets = [0, 9], sizes = [4, 1], strides = [1, 1]} : vector<4x12xf32> to vector<4x1xf32>
    %30 = vector.extract_strided_slice %10 {offsets = [3, 0], sizes = [1, 16], strides = [1, 1]} : vector<4x16xf32> to vector<1x16xf32>
    %31 = vector.broadcast %29 : vector<4x1xf32> to vector<4x16xf32>
    %32 = vector.broadcast %30 : vector<1x16xf32> to vector<4x16xf32>
    %33 = arith.mulf %31, %32 : vector<4x16xf32>
    %34 = arith.addf %28, %33 : vector<4x16xf32>
    %35 = vector.extract_strided_slice %8 {offsets = [0, 1], sizes = [4, 16], strides = [1, 1]} : vector<4x18xf32> to vector<4x16xf32>
    %36 = vector.extract_strided_slice %0 {offsets = [0, 1], sizes = [4, 1], strides = [1, 1]} : vector<4x12xf32> to vector<4x1xf32>
    %37 = vector.extract_strided_slice %35 {offsets = [0, 0], sizes = [1, 16], strides = [1, 1]} : vector<4x16xf32> to vector<1x16xf32>
    %38 = vector.broadcast %36 : vector<4x1xf32> to vector<4x16xf32>
    %39 = vector.broadcast %37 : vector<1x16xf32> to vector<4x16xf32>
    %40 = arith.mulf %38, %39 : vector<4x16xf32>
    %41 = arith.addf %34, %40 : vector<4x16xf32>
    %42 = vector.extract_strided_slice %0 {offsets = [0, 4], sizes = [4, 1], strides = [1, 1]} : vector<4x12xf32> to vector<4x1xf32>
    %43 = vector.extract_strided_slice %35 {offsets = [1, 0], sizes = [1, 16], strides = [1, 1]} : vector<4x16xf32> to vector<1x16xf32>
    %44 = vector.broadcast %42 : vector<4x1xf32> to vector<4x16xf32>
    %45 = vector.broadcast %43 : vector<1x16xf32> to vector<4x16xf32>
    %46 = arith.mulf %44, %45 : vector<4x16xf32>
    %47 = arith.addf %41, %46 : vector<4x16xf32>
    %48 = vector.extract_strided_slice %0 {offsets = [0, 7], sizes = [4, 1], strides = [1, 1]} : vector<4x12xf32> to vector<4x1xf32>
    %49 = vector.extract_strided_slice %35 {offsets = [2, 0], sizes = [1, 16], strides = [1, 1]} : vector<4x16xf32> to vector<1x16xf32>
    %50 = vector.broadcast %48 : vector<4x1xf32> to vector<4x16xf32>
    %51 = vector.broadcast %49 : vector<1x16xf32> to vector<4x16xf32>
    %52 = arith.mulf %50, %51 : vector<4x16xf32>
    %53 = arith.addf %47, %52 : vector<4x16xf32>
    %54 = vector.extract_strided_slice %0 {offsets = [0, 10], sizes = [4, 1], strides = [1, 1]} : vector<4x12xf32> to vector<4x1xf32>
    %55 = vector.extract_strided_slice %35 {offsets = [3, 0], sizes = [1, 16], strides = [1, 1]} : vector<4x16xf32> to vector<1x16xf32>
    %56 = vector.broadcast %54 : vector<4x1xf32> to vector<4x16xf32>
    %57 = vector.broadcast %55 : vector<1x16xf32> to vector<4x16xf32>
    %58 = arith.mulf %56, %57 : vector<4x16xf32>
    %59 = arith.addf %53, %58 : vector<4x16xf32>
    %60 = vector.extract_strided_slice %8 {offsets = [0, 2], sizes = [4, 16], strides = [1, 1]} : vector<4x18xf32> to vector<4x16xf32>
    %61 = vector.extract_strided_slice %0 {offsets = [0, 2], sizes = [4, 1], strides = [1, 1]} : vector<4x12xf32> to vector<4x1xf32>
    %62 = vector.extract_strided_slice %60 {offsets = [0, 0], sizes = [1, 16], strides = [1, 1]} : vector<4x16xf32> to vector<1x16xf32>
    %63 = vector.broadcast %61 : vector<4x1xf32> to vector<4x16xf32>
    %64 = vector.broadcast %62 : vector<1x16xf32> to vector<4x16xf32>
    %65 = arith.mulf %63, %64 : vector<4x16xf32>
    %66 = arith.addf %59, %65 : vector<4x16xf32>
    %67 = vector.extract_strided_slice %0 {offsets = [0, 5], sizes = [4, 1], strides = [1, 1]} : vector<4x12xf32> to vector<4x1xf32>
    %68 = vector.extract_strided_slice %60 {offsets = [1, 0], sizes = [1, 16], strides = [1, 1]} : vector<4x16xf32> to vector<1x16xf32>
    %69 = vector.broadcast %67 : vector<4x1xf32> to vector<4x16xf32>
    %70 = vector.broadcast %68 : vector<1x16xf32> to vector<4x16xf32>
    %71 = arith.mulf %69, %70 : vector<4x16xf32>
    %72 = arith.addf %66, %71 : vector<4x16xf32>
    %73 = vector.extract_strided_slice %0 {offsets = [0, 8], sizes = [4, 1], strides = [1, 1]} : vector<4x12xf32> to vector<4x1xf32>
    %74 = vector.extract_strided_slice %60 {offsets = [2, 0], sizes = [1, 16], strides = [1, 1]} : vector<4x16xf32> to vector<1x16xf32>
    %75 = vector.broadcast %73 : vector<4x1xf32> to vector<4x16xf32>
    %76 = vector.broadcast %74 : vector<1x16xf32> to vector<4x16xf32>
    %77 = arith.mulf %75, %76 : vector<4x16xf32>
    %78 = arith.addf %72, %77 : vector<4x16xf32>
    %79 = vector.extract_strided_slice %0 {offsets = [0, 11], sizes = [4, 1], strides = [1, 1]} : vector<4x12xf32> to vector<4x1xf32>
    %80 = vector.extract_strided_slice %60 {offsets = [3, 0], sizes = [1, 16], strides = [1, 1]} : vector<4x16xf32> to vector<1x16xf32>
    %81 = vector.broadcast %79 : vector<4x1xf32> to vector<4x16xf32>
    %82 = vector.broadcast %80 : vector<1x16xf32> to vector<4x16xf32>
    %83 = arith.mulf %81, %82 : vector<4x16xf32>
    %84 = arith.addf %78, %83 : vector<4x16xf32>
    %cst_12 = arith.constant 0.000000e+00 : f32
    %85 = vector.broadcast %cst_12 : f32 to vector<4x16xf32>
    %86 = arith.maximumf %84, %85 : vector<4x16xf32>
    %87 = vector.extract_strided_slice %86 {offsets = [0, 1], sizes = [4, 15], strides = [1, 1]} : vector<4x16xf32> to vector<4x15xf32>
    %88 = tpu.concatenate %87, %3 in 1 : vector<4x15xf32>, vector<4x1xf32> -> vector<4x16xf32>
    %89 = arith.addf %86, %88 : vector<4x16xf32>
    %90 = tpu.concatenate %5, %89, %5 in 1 : vector<4x2xf32>, vector<4x16xf32>, vector<4x2xf32> -> vector<4x20xf32>
    %cst_13 = arith.constant 0.000000e+00 : f32
    %91 = vector.broadcast %cst_13 : f32 to vector<4x16xf32>
    %92 = vector.extract_strided_slice %1 {offsets = [0, 0], sizes = [4, 1], strides = [1, 1]} : vector<4x3xf32> to vector<4x1xf32>
    %93 = vector.extract_strided_slice %90 {offsets = [0, 0], sizes = [4, 16], strides = [1, 1]} : vector<4x20xf32> to vector<4x16xf32>
    %94 = vector.broadcast %92 : vector<4x1xf32> to vector<4x16xf32>
    %95 = arith.mulf %94, %93 : vector<4x16xf32>
    %96 = arith.addf %91, %95 : vector<4x16xf32>
    %97 = vector.extract_strided_slice %1 {offsets = [0, 1], sizes = [4, 1], strides = [1, 1]} : vector<4x3xf32> to vector<4x1xf32>
    %98 = vector.extract_strided_slice %90 {offsets = [0, 2], sizes = [4, 16], strides = [1, 1]} : vector<4x20xf32> to vector<4x16xf32>
    %99 = vector.broadcast %97 : vector<4x1xf32> to vector<4x16xf32>
    %100 = arith.mulf %99, %98 : vector<4x16xf32>
    %101 = arith.addf %96, %100 : vector<4x16xf32>
    %102 = vector.extract_strided_slice %1 {offsets = [0, 2], sizes = [4, 1], strides = [1, 1]} : vector<4x3xf32> to vector<4x1xf32>
    %103 = vector.extract_strided_slice %90 {offsets = [0, 4], sizes = [4, 16], strides = [1, 1]} : vector<4x20xf32> to vector<4x16xf32>
    %104 = vector.broadcast %102 : vector<4x1xf32> to vector<4x16xf32>
    %105 = arith.mulf %104, %103 : vector<4x16xf32>
    %106 = arith.addf %101, %105 : vector<4x16xf32>
    %cst_14 = arith.constant dense<0.000000e+00> : vector<16xf32>
    %107 = vector.multi_reduction <add>, %106, %cst_14 [0] : vector<4x16xf32> to vector<16xf32>
    %108 = vector.shape_cast %107 : vector<16xf32> to vector<1x16xf32>
    %cst_15 = arith.constant dense<0.000000e+00> : vector<1x8xf32>
    %109 = tpu.matmul %108, %2, %cst_15 {dimension_numbers = #tpu.dot_dimension_numbers<[1], [0], [0], [1], [0, 0, 1, 1], [], []>} : vector<1x16xf32>, vector<16x8xf32>, vector<1x8xf32> -> vector<1x8xf32>
    %110 = math.tanh %109 : vector<1x8xf32>
    %c0_16 = arith.constant 0 : index
    %c0_17 = arith.constant 0 : index
    %c0_18 = arith.constant 0 : index
    %111 = vector.load %arg5[%c0_16, %c0_17, %c0_18] : memref<1x1x8xf32, #tpu.memory_space<vmem>>, vector<1x1x8xf32>
    %112 = vector.shape_cast %111 : vector<1x1x8xf32> to vector<1x8xf32>
    %113 = vector.shape_cast %110 : vector<1x8xf32> to vector<1x1x8xf32>
    tpu.vector_store %arg5[%c0_16, %c0_17, %c0_18], %113 {strides = array<i32>} : memref<1x1x8xf32, #tpu.memory_space<vmem>>, vector<1x1x8xf32>,
    return
  }
  func.func @transform_0(%arg0: i32) -> (i32, i32, i32, i32) {
    %c0_i32 = arith.constant 0 : i32
    %c0_i32_0 = arith.constant 0 : i32
    %c0_i32_1 = arith.constant 0 : i32
    %c0_i32_2 = arith.constant 0 : i32
    return %arg0, %c0_i32, %c0_i32_0, %c0_i32_1 : i32, i32, i32, i32
  }
  func.func @transform_1(%arg0: i32) -> (i32, i32) {
    %c0_i32 = arith.constant 0 : i32
    %c0_i32_0 = arith.constant 0 : i32
    %c0_i32_1 = arith.constant 0 : i32
    return %c0_i32, %c0_i32_0 : i32, i32
  }
  func.func @transform_2(%arg0: i32) -> (i32, i32) {
    %c0_i32 = arith.constant 0 : i32
    %c0_i32_0 = arith.constant 0 : i32
    %c0_i32_1 = arith.constant 0 : i32
    return %c0_i32, %c0_i32_0 : i32, i32
  }
  func.func @transform_3(%arg0: i32) -> (i32, i32) {
    %c0_i32 = arith.constant 0 : i32
    %c0_i32_0 = arith.constant 0 : i32
    %c0_i32_1 = arith.constant 0 : i32
    return %c0_i32, %c0_i32_0 : i32, i32
  }
  func.func @transform_4(%arg0: i32) -> (i32, i32, i32) {
    %c0_i32 = arith.constant 0 : i32
    %c0_i32_0 = arith.constant 0 : i32
    %c0_i32_1 = arith.constant 0 : i32
    return %arg0, %c0_i32, %c0_i32_0 : i32, i32, i32
  }
}

</mosaic_0001>

<bundles_post_ra>
// kernel: tpu_custom_call.1
= control target key start
LH: loop header
LB: loop body
LE: loop exit
PB: predicated region body
PF: predicated region fallthrough
CT: control target
= control target key end

     0   :  { %9 = vsyncpa [#allocation3], 0  ;;  %s838_s0 = inlined_call_operand.vmem [shape: f32[2,1,4,16], index: 0, kind: input, shape index: {}]   ;;  %s839_s1 = inlined_call_operand.vmem [shape: f32[4,12], index: 1, kind: input, shape index: {}]   ;;  %s840_s2 = inlined_call_operand.vmem [shape: f32[4,3], index: 2, kind: input, shape index: {}]   ;;  %s841_s3 = inlined_call_operand.vmem [shape: f32[16,8], index: 3, kind: input, shape index: {}]   ;;  %s842_s4 = inlined_call_operand.hbm [shape: f32[2,1,8], index: 4, kind: output, shape index: {}]  }
   0x1   :  { %11 = vsyncpa [#allocation3 + $0x1], 0  ;;  %s723_s15 = smov 0   ;;  %s725_s16 = smov 0  }
   0x2   :  { %s727_s17 = smov 0   ;;  %s729_s18 = smov 0  }
   0x3 LB: > { %s744_s19 = sadd.s32 4294967295, %s676_s18   ;;  %s522_s20 = sadd.s32 4294967294, %s676_s18   ;;  %s676_s18 = sphi %s729_s18, %s848_s18   ;;  %s672_s17 = sphi %s727_s17, %s847_s17   ;;  %s668_s16 = sphi %s725_s16, %s846_s16   ;;  %s664_s15 = sphi %s723_s15, %s845_s15  }
   0x4   : > { %s748_s21 = sadd.s32 1, %s676_s18   ;;  %s113_s22 = sadd.s32 1, %s672_s17 }
   0x5   : > { %s110_s23 = ssub.s32 %s676_s18, %s748_s21  ;;  %p123_p0 = scmp.ne.s32.totalorder %s672_s17, %s668_s16 }
   0x6   : > { %p111_p1 = scmp.eq.s32.totalorder %s110_s23, 0  ;;  %p124_p2 = scmp.eq.s32.totalorder %s744_s19, 1 }
   0x7   : > { %p129_p3 = scmp.ne.s32.totalorder %s668_s16, %s664_s15  ;;  %p130_p4 = scmp.eq.s32.totalorder %s522_s20, 1 }
   0x8   : > { %s759_s24 = scalar_select %p111_p1, %s672_s17, %s113_s22  }
   0x9   : > { %p761_p5 = por %p124_p2, %p123_p0  ;;  %p765_p6 = por %p130_p4, %p129_p3 }
   0xa   : > { %p525_p7 = scmp.ge.s32.totalorder %s676_s18, 1  ;;  %p164_p8 = scmp.lt.s32.totalorder %s676_s18, 3 }
   0xc   : > { %p165_p9 = pnand %p525_p7, %p164_p8 }
   0xd   : > { %p188_p10 = scmp.lt.s32.totalorder (!%p165_p9), %s744_s19, 1  ;;  %s682_s8 = smov (!%p165_p9), 1  }
   0xe   : > { %168 = sbr.rel (%p165_p9) target bundleno = 877 (0x36d), region = 36  ;;  %s691_s9 = smov (!%p165_p9), 127  }
   0xf   : > { %s692_s10 = smov (!%p165_p9), 126   ;;  %s693_s13 = smov (!%p165_p9), 2  }
  0x10   : > { %s696_s22 = smov (!%p165_p9), 124   ;;  %s186_s28 = sand.u32 (!%p165_p9), 1, %s668_s16  }
  0x11   : > { %s697_s11 = smov (!%p165_p9), [#allocation2]  }
  0x12   : > { %s620_s12 = sshll.u32 (!%p165_p9), %s697_s11, 4  ;;  %s621_s12 = int_to_ptr.vmem [resolvable:$false] %s620_s12 }
  0x13   : > { %v192_v0 = vld [vmem:[%s839_s1] sm:$0xf]  ;;  %v678_v1 = vmov 4   ;;  %v679_v2 = vmov 1   ;;  %s189_s29 = scalar_select %p188_p10, %s744_s19, 1  ;;  %v680_v3 = vmov 7   ;;  %v210_v14 = vlaneseq }
  0x14   : > { %600 = vset.pattern.permute.xlu1 %v678_v1  ;;  %599 = vset.pattern.permute.xlu0 %v679_v2  ;;  %v681_v5 = vmov 10   ;;  %v683_v6 = vmov 2   ;;  %v684_v7 = vmov 8   ;;  %v685_v8 = vmov 5   ;;  %v193_v44 = vld [vmem:[%s840_s2] sm:$0xf] }
  0x15   : > { %257 = vperm.xlu1 %600, %v192_v0   ;;  %247 = vperm.xlu0 %599, %v192_v0   ;;  %s526_s30 = sshll.u32 %s189_s29, 2  ;;  %v686_v9 = vmov 3   ;;  %v687_v10 = vmov 11   ;;  %v688_v11 = vmov 0   ;;  %v689_v12 = vmov 6   ;;  %s528_s29 = sshll.u32 %s744_s19, 4 }
  0x16   : > { %s191_s7 = scalar_lea.vmem %s838_s0, %s526_s30  ;;  %v690_v13 = vmov 9   ;;  %v211_v15 = vshrl.u32 %v210_v14, 7  ;;  %vm201_vm0 = vcmask 7168   ;;  %vm203_vm1 = vcmask 138240   ;;  %s187_s30 = scalar_lea.vmem [#allocation2], %s186_s28 }
  0x17   : > { %v196_v4 = vld [vmem:[%s191_s7] sm:$0xf]  ;;  %vm331_vm2 = vcmask 121856   ;;  %vm338_vm3 = vcmask 15360   ;;  %vm340_vm4 = vcmask 146432   ;;  %vm695_vm5 = vmmov 0  }
  0x18   : > { %v222_v18 = vsub.s32 1, %v211_v15  ;;  %v212_v19 = vsub.s32 0, %v211_v15  ;;  %v232_v22 = vsub.s32 2, %v211_v15  ;;  %v242_v24 = vsub.s32 3, %v211_v15  ;;  %s467_s5 = sshll.u32 %s187_s30, 4  ;;  %s622_s19 = scalar_lea.vmem %s621_s12, 32  ;;  %s468_s5 = int_to_ptr.vmem [resolvable:$true] %s467_s5 }
  0x19   : > { %601 = vset.pattern.permute.xlu1 %v680_v3  ;;  %602 = vset.pattern.permute.xlu0 %v681_v5  ;;  %vm369_vm6 = vcmask 125952   ;;  %vm377_vm7 = vcmask 130048   ;;  %vm452_vm8 = vcmask 57344   ;;  %p623_p0 = scmp.lt.s32.totalorder %s468_s5, %s621_s12 }
  0x1a   : > { %267 = vperm.xlu1 %601, %v192_v0   ;;  %198 = vrot.lane.b32.xlu0 %v196_v4, %s682_s8  ;;  %s803_s8 = scalar_lea.hbm %s842_s4, %s528_s29 }
  0x1e   : > { %603 = vset.pattern.permute.xlu1 %v683_v6  ;;  %277 = vperm.xlu0 %602, %v192_v0  }
  0x1f   : > { %287 = vperm.xlu1 %603, %v192_v0  }
  0x22   : > { %605 = vset.pattern.permute.xlu0 %v684_v7 }
  0x23   : > { %604 = vset.pattern.permute.xlu1 %v685_v8  ;;  %307 = vperm.xlu0 %605, %v192_v0  }
  0x24   : > { %297 = vperm.xlu1 %604, %v192_v0  }
  0x27   : > { %608 = vset.pattern.permute.xlu0 %v686_v9 }
  0x28   : > { %606 = vset.pattern.permute.xlu1 %v687_v10  ;;  %217 = vperm.xlu0 %608, %v192_v0  }
  0x29   : > { %317 = vperm.xlu1 %606, %v192_v0  }
  0x2c   : > { %612 = vset.pattern.permute.xlu0 %v683_v6 }
  0x2d   : > { %607 = vset.pattern.permute.xlu1 %v688_v11 }
  0x2e   : > { %207 = vperm.xlu1 %607, %v192_v0  }
  0x32   : > { %609 = vset.pattern.permute.xlu1 %v689_v12 }
  0x33   : > { %227 = vperm.xlu1 %609, %v192_v0  }
  0x37   : > { %610 = vset.pattern.permute.xlu1 %v690_v13 }
  0x38   : > { %237 = vperm.xlu1 %610, %v192_v0  }
  0x3c   : > { %611 = vset.pattern.permute.xlu1 %v679_v2 }
  0x90   : > { %v248_v16 = vpop.permute.xlu0 %247  ;;  %v258_v17 = vpop.permute.xlu1 %257 }
  0x94   : > { %v199_v20 = vpop.permute.xlu0 %198 }
  0x95   : > { %v202_v21 = vsel %vm201_vm0, 0.0, %v199_v20  ;;  %v268_v23 = vpop.permute.xlu1 %267  ;;  %v194_v20 = vld [vmem:[%s841_s3] sm:$0xff] }
  0x96   : > { %v204_v25 = vsel %vm203_vm1, %v202_v21, 0.0 }
  0x97   : > { %v223_v26 = vrot.slane %v204_v25, %v222_v18  ;;  %v213_v27 = vrot.slane %v204_v25, %v212_v19  ;;  %v233_v28 = vrot.slane %v204_v25, %v232_v22  ;;  %v243_v29 = vrot.slane %v204_v25, %v242_v24  ;;  %v195_v18 = vld [vmem:[%s841_s3 + $0x8] sm:$0xff] }
  0x98   : > { %v694_v19 = vmov 0.0  }
  0x99   : > { %v260_v30 = vmul.f32 %v258_v17, %v223_v26  ;;  %v250_v31 = vmul.f32 %v248_v16, %v213_v27  ;;  %v278_v32 = vpop.permute.xlu0 %277  ;;  %v270_v34 = vmul.f32 %v268_v23, %v233_v28  ;;  %534 = vmatprep.subr.mxu0 %v694_v19  ;;  %538 = vmatprep.mubr.msk.f32.mxu0 %vm695_vm5, %v694_v19 }
  0x9a   : > { %v288_v33 = vpop.permute.xlu1 %287  ;;  %v280_v35 = vmul.f32 %v278_v32, %v243_v29  ;;  %535 = vmatpush3.msra.mxu0 %v195_v18 }
  0x9b   : > { %262 = vrot.lane.b32.xlu1 %v260_v30, %s691_s9  ;;  %252 = vrot.lane.b32.xlu0 %v250_v31, %s691_s9  ;;  %v290_v38 = vmul.f32 %v288_v33, %v213_v27 }
  0x9c   : > { %536 = vmatprep.subr.mxu0 %v694_v19 }
  0x9d   : > { %537 = vmatpush3.msra.mxu0 %v194_v20 }
  0x9e   : > { %v308_v39 = vpop.permute.xlu0 %307 }
  0x9f   : > { %v298_v36 = vpop.permute.xlu1 %297  ;;  %272 = vrot.lane.b32.xlu0 %v270_v34, %s691_s9  ;;  %282 = vrot.lane.b32.xlu1 %v280_v35, %s691_s9  ;;  %v310_v41 = vmul.f32 %v308_v39, %v233_v28 }
  0xa0   : > { %v300_v37 = vmul.f32 %v298_v36, %v223_v26 }
  0xa3   : > { %292 = vrot.lane.b32.xlu0 %v290_v38, %s692_s10  ;;  %302 = vrot.lane.b32.xlu1 %v300_v37, %s692_s10  ;;  %v218_v43 = vpop.permute.xlu0 %217 }
  0xa4   : > { %v318_v40 = vpop.permute.xlu1 %317  ;;  %v224_v46 = vmul.f32 %v223_v26, %v218_v43 }
  0xa5   : > { %v320_v42 = vmul.f32 %v318_v40, %v243_v29 }
  0xa7   : > { %322 = vrot.lane.b32.xlu1 %v320_v42, %s692_s10  ;;  %312 = vrot.lane.b32.xlu0 %v310_v41, %s692_s10 }
  0xa9   : > { %v208_v45 = vpop.permute.xlu1 %207 }
  0xaa   : > { %v214_v47 = vmul.f32 %v213_v27, %v208_v45 }
  0xab   : > { %350 = vperm.xlu1 %611, %v193_v44  }
  0xac   : > { %v225_v48 = vadd.f32 %v224_v46, %v214_v47 }
  0xae   : > { %v228_v49 = vpop.permute.xlu1 %227 }
  0xaf   : > { %v234_v50 = vmul.f32 %v233_v28, %v228_v49  ;;  %613 = vset.pattern.permute.xlu1 %v688_v11 }
  0xb1   : > { %v235_v51 = vadd.f32 %v234_v50, %v225_v48 }
  0xb3   : > { %v238_v52 = vpop.permute.xlu1 %237 }
  0xb4   : > { %v244_v53 = vmul.f32 %v243_v29, %v238_v52 }
  0xb6   : > { %v245_v54 = vadd.f32 %v244_v53, %v235_v51 }
 0x10d   : > { %v263_v55 = vpop.permute.xlu1 %262  ;;  %v253_v56 = vpop.permute.xlu0 %252 }
 0x10e   : > { %v255_v57 = vadd.f32 %v253_v56, %v245_v54 }
 0x110   : > { %v265_v58 = vadd.f32 %v263_v55, %v255_v57 }
 0x111   : > { %v283_v59 = vpop.permute.xlu1 %282  ;;  %v273_v60 = vpop.permute.xlu0 %272 }
 0x112   : > { %v275_v61 = vadd.f32 %v273_v60, %v265_v58 }
 0x114   : > { %v285_v62 = vadd.f32 %v283_v59, %v275_v61 }
 0x115   : > { %v303_v63 = vpop.permute.xlu1 %302  ;;  %v293_v0 = vpop.permute.xlu0 %292 }
 0x116   : > { %v295_v1 = vadd.f32 %v293_v0, %v285_v62 }
 0x118   : > { %v305_v2 = vadd.f32 %v303_v63, %v295_v1 }
 0x119   : > { %v313_v3 = vpop.permute.xlu0 %312  ;;  %v323_v5 = vpop.permute.xlu1 %322 }
 0x11a   : > { %v315_v4 = vadd.f32 %v313_v3, %v305_v2 }
 0x11c   : > { %v325_v6 = vadd.f32 %v323_v5, %v315_v4 }
 0x11e   : > { %v326_v7 = vmax.f32 %v325_v6, 0.0 }
 0x120   : > { %328 = vrot.lane.b32.xlu0 %v326_v7, %s691_s9  ;;  %s455_s9 = scalar_lea.sflag [#allocation3], %s186_s28 }
 0x124   : > { %360 = vperm.xlu0 %612, %v193_v44  }
 0x126   : > { %v351_v11 = vpop.permute.xlu1 %350 }
 0x192   : > { %v329_v8 = vpop.permute.xlu0 %328 }
 0x193   : > { %v332_v9 = vsel %vm331_vm2, %v329_v8, 0.0 }
 0x194   : > { %v333_v10 = vadd.f32 %v332_v9, %v326_v7 }
 0x196   : > { %335 = vrot.lane.b32.xlu1 %v333_v10, %s693_s13 }
 0x19a   : > { %344 = vperm.xlu1 %613, %v193_v44  }
 0x19f   : > { %v361_v13 = vpop.permute.xlu0 %360 }
 0x208   : > { %v336_v12 = vpop.permute.xlu1 %335 }
 0x209   : > { %v339_v14 = vsel %vm338_vm3, 0.0, %v336_v12 }
 0x20a   : > { %v341_v15 = vsel %vm340_vm4, %v339_v14, 0.0 }
 0x20b   : > { %v353_v16 = vmul.f32 %v351_v11, %v341_v15  ;;  %v363_v17 = vmul.f32 %v361_v13, %v341_v15 }
 0x20d   : > { %355 = vrot.lane.b32.xlu0 %v353_v16, %s692_s10  ;;  %365 = vrot.lane.b32.xlu1 %v363_v17, %s696_s22  ;;  %s616_s10 = scalar_lea.vmem %s468_s5, 16 }
 0x20e   : > { %p617_p11 = scmp.ne.s32.totalorder %s468_s5, %s616_s10  ;;  %p624_p1 = scmp.lt.s32.totalorder %s622_s19, %s616_s10 }
 0x210   : > { %p618_p12 = pnand %p617_p11, %p761_p5  ;;  %p625_p2 = por %p624_p1, %p623_p0 }
 0x212   : > { %p619_p13 = pneg %p618_p12 }
 0x214   : > { %p626_p3 = pnand %p625_p2, %p619_p13 }
 0x215   : > { %v345_v21 = vpop.permute.xlu1 %344 }
 0x216   : > { %v347_v22 = vmul.f32 %v345_v21, %v341_v15 }
 0x27f   : > { %v356_v23 = vpop.permute.xlu0 %355  ;;  %v366_v25 = vpop.permute.xlu1 %365 }
 0x280   : > { %v358_v24 = vadd.f32 %v356_v23, %v347_v22 }
 0x282   : > { %v368_v26 = vadd.f32 %v366_v25, %v358_v24 }
 0x284   : > { %v370_v27 = vsel %vm369_vm6, %v368_v26, 0.0 }
 0x285   : > { %v371_v28 = vrot.slane %v370_v27, 4 }
 0x287   : > { %v372_v29 = vadd.f32 %v371_v28, %v370_v27 }
 0x289   : > { %v373_v30 = vrot.slane %v372_v29, 2 }
 0x28b   : > { %v374_v31 = vadd.f32 %v373_v30, %v372_v29 }
 0x28d   : > { %v375_v32 = vrot.slane %v374_v31, 1 }
 0x28f   : > { %v376_v33 = vadd.f32 %v375_v32, %v374_v31 }
 0x291   : > { %539 = vmatmul.mubr.msk.f32.vlgmr.msra.gmra.mxu0 %vm377_vm7, %v376_v33 }
 0x351   : > { %v447_v34 = vpop.f32.mrf.mxu0 }
 0x352   : > { %614 = vtanh.f32 %v447_v34 }
 0x353   : > { %v540_v35 = vpop.f32.mrf.mxu0 }
 0x35f   : > { %v615_v36 = vpop.eup %614 }
 0x360   : > { %453 = vst.msk [vmem:[%s187_s30] sm:$0x1] %vm452_vm8, %v615_v36 }
 0x361   : > { %629 = shalt.err (!%p626_p3)
}
 0x362   : > { %s630_s13 = scalar_lea.hbm %s803_s8, 16  ;;  %s634_s22 = scalar_lea.hbm %s842_s4, 32 }
 0x363   : > { %p631_p4 = scmp.ne.s32.totalorder %s803_s8, %s630_s13  ;;  %p635_p9 = scmp.lt.s32.totalorder %s803_s8, %s842_s4 }
 0x364   : > { %p636_p10 = scmp.lt.s32.totalorder %s634_s22, %s630_s13 }
 0x365   : > { %p632_p7 = pnand %p631_p4, %p761_p5 }
 0x366   : > { %p637_p11 = por %p636_p10, %p635_p9 }
 0x367   : > { %p633_p8 = pneg %p632_p7 }
 0x369   : > { %p638_p12 = pnand %p637_p11, %p633_p8 }
 0x36b   : > { %641 = shalt.err (!%p638_p12)
}
 0x36c   : > { %541 = dma.vmem_to_hbm [thread:$0]  (%p761_p5), %s468_s5, 16, %s803_s8, %s455_s9  }
 0x36d PF: > { %p547_p13 = scmp.ge.s32.totalorder %s676_s18, 2  ;;  %s479_s28 = sand.u32 1, %s664_s15  }
 0x36e   : > { %s480_s29 = scalar_lea.sflag [#allocation3], %s479_s28 }
 0x36f   : > { %p544_p0 = pnand %p547_p13, %p765_p6 }
 0x371   : > { %p545_p1 = pneg %p544_p0 }
 0x373   : > { %659 = dma.done.wait (%p545_p1), %s480_s29, 16  }
 0x374   : > { %661 = vsyncadd (%p545_p1), %s480_s29, 4294967280  ;;  %p14_p2 = scmp.ge.s32.totalorder %s748_s21, 4   ;;  %s845_s15 = smov %s668_s16 }
 0x375   : > { %s846_s16 = smov %s672_s17  ;;  %s847_s17 = smov %s759_s24 }
 0x376   : > { %s848_s18 = smov %s748_s21  ;;  %16 = sbr.rel (!%p14_p2) target bundleno = 3 (0x3), region = 71 }
 0x37b   :  { %484 = vsyncpa [#allocation3], 1 }
 0x37c   :  { %486 = vsyncpa [#allocation3 + $0x1], 1 }

</bundles_post_ra>
